<compile_context>
chip_gen: v7x
topology: tpu7x:2x2x1
jax: 0.10.0
libtpu: 0.0.40
codegen_flags: <defaults>
</compile_context>

<pallas_src>
import functools

import jax
import jax.numpy as jnp
from jax.experimental import pallas as pl
from jax.experimental.pallas import tpu as pltpu

LANE = 128
VMEM_LIMIT_BYTES = 48 * 1024 * 1024  # < v7x 64 MiB physical; > v5e/v6e scoped defaults


# ----------------------------- in-kernel helpers -----------------------------

def _layernorm(x, g, b, eps=1e-5):
    # PyTorch nn.LayerNorm: biased variance, eps inside rsqrt.  Kept in f32.
    mu = jnp.mean(x, axis=-1, keepdims=True)
    var = jnp.mean((x - mu) ** 2, axis=-1, keepdims=True)
    return (x - mu) * jax.lax.rsqrt(var + eps) * g + b


def _gelu_exact(x):
    # nn.GELU() default = exact (erf) GELU, f32, for spec fidelity.
    # (tanh-approx would move this to the EUP slot on v6e/v7x if numerics allow.)
    return 0.5 * x * (1.0 + jax.lax.erf(x * 0.7071067811865476))


# --------------------------- patch-embedding kernel ---------------------------

def patch_embed_kernel(patches_ref, cls_ref, pos_ref,
                       ln1_g, ln1_b, pw, pb, ln2_g, ln2_b,
                       tok_ref, *, mean, std):
    bt, n, pd = patches_ref.shape
    d = pos_ref.shape[-1]
    bf16 = jnp.bfloat16

    p = (patches_ref[...].reshape(bt * n, pd) - mean) / std
    p = _layernorm(p, ln1_g[...], ln1_b[...])
    emb = jnp.dot(p.astype(bf16), pw[...],
                  preferred_element_type=jnp.float32) + pb[...]
    emb = _layernorm(emb, ln2_g[...], ln2_b[...])                      # (bt*n, D)

    # Store cls+pos[0] and patch_emb+pos[1:] directly (no concatenate).
    cls_pos = (cls_ref[...] + pos_ref[0:1, :]).reshape(1, 1, d)
    tok_ref[:, 0:1, :] = jnp.broadcast_to(cls_pos, (bt, 1, d))
    tok_ref[:, 1:, :] = emb.reshape(bt, n, d) + pos_ref[1:, :].reshape(1, n, d)


# --------------------------- fused transformer kernel -------------------------

def transformer_kernel(toks_ref,
                       aln_g, aln_b, wqkv, wo, bo,
                       fln_g, fln_b, w1, b1, w2, b2,
                       hln_g, hln_b, hw, hb,
                       logits_ref, tok_ref,
                       *, heads, dim_head, scale, n_tok, bt):
    layer = pl.program_id(1)
    inner = heads * dim_head
    m = bt * n_tok
    bf16 = jnp.bfloat16

    # Layer 0: load this batch block's tokens into the resident VMEM scratch.
    @pl.when(layer == 0)
    def _load_tokens():
        tok_ref[...] = toks_ref[...].reshape(m, toks_ref.shape[-1])

    x = tok_ref[...]                                       # (Bt*n_tok, D) f32
    d = x.shape[-1]

    # ---- attention (pre-LN); per-head unroll, no swapaxes/XLU relayouts ----
    xn = _layernorm(x, aln_g[...], aln_b[...])
    qkv = jnp.dot(xn.astype(bf16), wqkv[...],
                  preferred_element_type=jnp.float32)      # (m, 3*inner)

    proj = jnp.zeros((m, d), jnp.float32)
    for h in range(heads):
        lo = h * dim_head
        q = (qkv[:, lo:lo + dim_head] * scale).reshape(bt, n_tok, dim_head)
        k = qkv[:, inner + lo:inner + lo + dim_head].reshape(bt, n_tok, dim_head)
        v = qkv[:, 2 * inner + lo:2 * inner + lo + dim_head].reshape(bt, n_tok, dim_head)

        s = jax.lax.dot_general(                           # (bt, n_tok, n_tok)
            q.astype(bf16), k.astype(bf16),
            dimension_numbers=(((2,), (2,)), ((0,), (0,))),
            preferred_element_type=jnp.float32)
        s = s - jnp.max(s, axis=-1, keepdims=True)         # f32 softmax
        e = jnp.exp(s)
        attn = e * pl.reciprocal(jnp.sum(e, axis=-1, keepdims=True), approx=True)

        ctx = jax.lax.dot_general(                         # (bt, n_tok, dh)
            attn.astype(bf16), v.astype(bf16),
            dimension_numbers=(((2,), (1,)), ((0,), (0,))),
            preferred_element_type=jnp.float32)

        # Output projection folded per head: sum_h ctx_h @ Wo[h] == ctx @ Wo
        # (avoids the 'h n d -> n (h d)' relayout entirely).
        proj = proj + jnp.dot(ctx.reshape(m, dim_head).astype(bf16),
                              wo[lo:lo + dim_head, :],
                              preferred_element_type=jnp.float32)

    x = x + proj + bo[...]                                 # residual (+ to_out bias)

    # ---- feedforward (pre-LN) ----
    xn2 = _layernorm(x, fln_g[...], fln_b[...])
    h1 = jnp.dot(xn2.astype(bf16), w1[...],
                 preferred_element_type=jnp.float32) + b1[...]
    h1 = _gelu_exact(h1)
    h2 = jnp.dot(h1.astype(bf16), w2[...],
                 preferred_element_type=jnp.float32) + b2[...]
    y = x + h2                                             # residual
    tok_ref[...] = y                                       # stays resident in VMEM

    # ---- last layer: LN + Linear head on the cls rows (lane-padded output) ----
    @pl.when(layer == pl.num_programs(1) - 1)
    def _head():
        cls_rows = jnp.concatenate(
            [y[i * n_tok:i * n_tok + 1, :] for i in range(bt)], axis=0)   # (bt, D)
        cls_n = _layernorm(cls_rows, hln_g[...], hln_b[...])
        logits_ref[...] = jnp.dot(cls_n.astype(bf16), hw[...],
                                  preferred_element_type=jnp.float32) + hb[...]


# ------------------------------- wrapper --------------------------------------

def vit_1d_forward(x, params, cfg, *, block_batch=None):
    B, C, L = x.shape
    p_sz = cfg["patch_size"]
    n = L // p_sz
    pd = C * p_sz
    D = cfg["dim_embed"]
    heads, dim_head = cfg["heads"], cfg["dim_head"]
    inner = heads * dim_head
    mlp = cfg["mlp_dim"]
    n_layers = cfg["trans_layers"]
    n_tok = n + 1
    out_dims = cfg["out_dims"]
    out_pad = params["head"]["w"].shape[1]

    # Bt batch rows per grid step (fills MXU M-dim, amortizes per-layer weight DMA).
    Bt = block_batch if block_batch is not None else B
    assert B % Bt == 0, "batch must be divisible by block_batch"

    # einops 'b c (n p) -> b n (p c)'
    patches = x.reshape(B, C, n, p_sz).transpose(0, 2, 3, 1).reshape(B, n, pd)

    pp, hp, lp = params["patch"], params["head"], params["layers"]

    # ---- call 1: patch embedding + cls/pos tokens -> (B, n_tok, D) ----
    const2 = lambda shape: pl.BlockSpec(shape, lambda b: (0, 0))
    toks = pl.pallas_call(
        functools.partial(patch_embed_kernel, mean=cfg["mean"], std=cfg["std"]),
        out_shape=jax.ShapeDtypeStruct((B, n_tok, D), jnp.float32),
        grid=(B // Bt,),
        in_specs=[
            pl.BlockSpec((Bt, n, pd), lambda b: (b, 0, 0)),    # patches
            const2((1, D)),                                    # cls token
            const2((n_tok, D)),                                # pos embedding
            const2((1, pd)), const2((1, pd)),                  # patch LN1
            const2((pd, D)), const2((1, D)),                   # patch Linear
            const2((1, D)), const2((1, D)),                    # patch LN2
        ],
        out_specs=pl.BlockSpec((Bt, n_tok, D), lambda b: (b, 0, 0)),
        compiler_params=pltpu.CompilerParams(
            dimension_semantics=("parallel",),
            vmem_limit_bytes=VMEM_LIMIT_BYTES),
    )(patches, params["cls_token"], params["pos_embedding"],
      pp["ln1_g"], pp["ln1_b"], pp["w"], pp["b"], pp["ln2_g"], pp["ln2_b"])

    # ---- call 2: all transformer layers + mlp_head fused ----
    kern = functools.partial(transformer_kernel, heads=heads, dim_head=dim_head,
                             scale=dim_head ** (-0.5), n_tok=n_tok, bt=Bt)

    const2d = lambda shape: pl.BlockSpec(shape, lambda b, l: (0, 0))
    per_layer = lambda shape: pl.BlockSpec((pl.Squeezed(),) + shape,
                                           lambda b, l: (l, 0, 0))

    out = pl.pallas_call(
        kern,
        out_shape=jax.ShapeDtypeStruct((B // Bt, Bt, out_pad), jnp.float32),
        grid=(B // Bt, n_layers),                               # batch outer, layers inner
        in_specs=[
            pl.BlockSpec((Bt, n_tok, D), lambda b, l: (b, 0, 0)),   # tokens (read at l==0)
            per_layer((1, D)), per_layer((1, D)),                   # attn LN
            per_layer((D, 3 * inner)),                              # to_qkv (bf16)
            per_layer((inner, D)), per_layer((1, D)),               # to_out
            per_layer((1, D)), per_layer((1, D)),                   # ff LN
            per_layer((D, mlp)), per_layer((1, mlp)),               # ff Linear1
            per_layer((mlp, D)), per_layer((1, D)),                 # ff Linear2
            const2d((1, D)), const2d((1, D)),                       # head LN
            const2d((D, out_pad)), const2d((1, out_pad)),           # head Linear
        ],
        out_specs=pl.BlockSpec((pl.Squeezed(), Bt, out_pad), lambda b, l: (b, 0, 0)),
        scratch_shapes=[pltpu.VMEM((Bt * n_tok, D), jnp.float32)],  # resident tokens
        compiler_params=pltpu.CompilerParams(
            dimension_semantics=("parallel", "arbitrary"),
            vmem_limit_bytes=VMEM_LIMIT_BYTES),
    )(toks,
      lp["aln_g"], lp["aln_b"], lp["wqkv"], lp["wo"], lp["bo"],
      lp["fln_g"], lp["fln_b"], lp["w1"], lp["b1"], lp["w2"], lp["b2"],
      hp["ln_g"], hp["ln_b"], hp["w"], hp["b"])

    return out.reshape(B, out_pad)[:, :out_dims]


# ------------------------------ parameter init --------------------------------

def init_params(key, *, channels, patch_size, seq_len, dim_embed, trans_layers,
                heads, dim_head, mlp_dim, out_dims):
    num_patches = seq_len // patch_size
    patch_dim = channels * patch_size
    inner = heads * dim_head
    out_pad = ((out_dims + LANE - 1) // LANE) * LANE

    keys = iter(jax.random.split(key, 64))

    def nrm(shape, scale=0.02):
        return (scale * jax.random.normal(next(keys), shape)).astype(jnp.float32)

    ones = lambda s: jnp.ones(s, jnp.float32)
    zeros = lambda s: jnp.zeros(s, jnp.float32)

    # head weight zero-padded to a lane-dense (D, out_pad) slab
    hw = jnp.zeros((dim_embed, out_pad), jnp.float32)
    hw = hw.at[:, :out_dims].set(nrm((dim_embed, out_dims)))

    params = {
        "patch": {
            "ln1_g": ones((1, patch_dim)), "ln1_b": zeros((1, patch_dim)),
            "w": nrm((patch_dim, dim_embed)).astype(jnp.bfloat16),
            "b": zeros((1, dim_embed)),
            "ln2_g": ones((1, dim_embed)), "ln2_b": zeros((1, dim_embed)),
        },
        "pos_embedding": nrm((num_patches + 1, dim_embed), scale=1.0),
        "cls_token": nrm((1, dim_embed), scale=1.0),
        # per-layer weights stacked with a leading layer axis (indexed by the
        # "arbitrary" layer grid dimension); matmul weights stored bf16.
        # TODO(synk): on v7x, fp8 weight storage would halve weight HBM traffic.
        "layers": {
            "aln_g": ones((trans_layers, 1, dim_embed)),
            "aln_b": zeros((trans_layers, 1, dim_embed)),
            "wqkv": nrm((trans_layers, dim_embed, 3 * inner)).astype(jnp.bfloat16),
            "wo": nrm((trans_layers, inner, dim_embed)).astype(jnp.bfloat16),
            "bo": zeros((trans_layers, 1, dim_embed)),
            "fln_g": ones((trans_layers, 1, dim_embed)),
            "fln_b": zeros((trans_layers, 1, dim_embed)),
            "w1": nrm((trans_layers, dim_embed, mlp_dim)).astype(jnp.bfloat16),
            "b1": zeros((trans_layers, 1, mlp_dim)),
            "w2": nrm((trans_layers, mlp_dim, dim_embed)).astype(jnp.bfloat16),
            "b2": zeros((trans_layers, 1, dim_embed)),
        },
        "head": {
            "ln_g": ones((1, dim_embed)), "ln_b": zeros((1, dim_embed)),
            "w": hw.astype(jnp.bfloat16),
            "b": zeros((1, out_pad)),
        },
    }
    return params


# ----------------------------------- main --------------------------------------

if __name__ == "__main__":
    cfg = dict(mean=0.5, std=2.0, seq_len=16, patch_size=4, channels=2,
               dim_embed=32, trans_layers=2, heads=4, dim_head=8,
               mlp_dim=64, out_dims=10)

    key = jax.random.PRNGKey(0)
    pkey, xkey = jax.random.split(key)

    params = init_params(
        pkey, channels=cfg["channels"], patch_size=cfg["patch_size"],
        seq_len=cfg["seq_len"], dim_embed=cfg["dim_embed"],
        trans_layers=cfg["trans_layers"], heads=cfg["heads"],
        dim_head=cfg["dim_head"], mlp_dim=cfg["mlp_dim"],
        out_dims=cfg["out_dims"])

    # batch=4 processed as two grid blocks of Bt=2 rows each
    # (B//Bt = 2 so the "parallel" batch axis can shard across v7x's two TCs).
    x = jax.random.normal(xkey, (4, cfg["channels"], cfg["seq_len"]),
                          dtype=jnp.float32)

    out = vit_1d_forward(x, params, cfg, block_batch=2)
    out = jax.block_until_ready(out)
    assert out.shape == (4, cfg["out_dims"]) and out.dtype == jnp.float32
    assert bool(jnp.all(jnp.isfinite(out)))
    print("KERNEL_OK")
</pallas_src>

<mosaic_0001>
module attributes {stable_mosaic.version = 11 : i64} {
  func.func @patch_embed_kernel(%arg0: i32, %arg1: memref<2x4x8xf32, #tpu.memory_space<vmem>>, %arg2: memref<1x32xf32, #tpu.memory_space<vmem>>, %arg3: memref<5x32xf32, #tpu.memory_space<vmem>>, %arg4: memref<1x8xf32, #tpu.memory_space<vmem>>, %arg5: memref<1x8xf32, #tpu.memory_space<vmem>>, %arg6: memref<8x32xbf16, #tpu.memory_space<vmem>>, %arg7: memref<1x32xf32, #tpu.memory_space<vmem>>, %arg8: memref<1x32xf32, #tpu.memory_space<vmem>>, %arg9: memref<1x32xf32, #tpu.memory_space<vmem>>, %arg10: memref<2x5x32xf32, #tpu.memory_space<vmem>>) attributes {dimension_semantics = [#tpu.dimension_semantics<parallel>], iteration_bounds = array<i64: 2>, scalar_prefetch = 0 : i64, scratch_operands = 0 : i64, tpu.core_type = #tpu.core_type<tc>, window_params = [{transform_indices = @transform_0, window_bounds = array<i64: 2, 4, 8>}, {pipeline_mode = #tpu.pipeline_mode<synchronous>, transform_indices = @transform_1, window_bounds = array<i64: 1, 32>}, {pipeline_mode = #tpu.pipeline_mode<synchronous>, transform_indices = @transform_2, window_bounds = array<i64: 5, 32>}, {pipeline_mode = #tpu.pipeline_mode<synchronous>, transform_indices = @transform_3, window_bounds = array<i64: 1, 8>}, {pipeline_mode = #tpu.pipeline_mode<synchronous>, transform_indices = @transform_4, window_bounds = array<i64: 1, 8>}, {pipeline_mode = #tpu.pipeline_mode<synchronous>, transform_indices = @transform_5, window_bounds = array<i64: 8, 32>}, {pipeline_mode = #tpu.pipeline_mode<synchronous>, transform_indices = @transform_6, window_bounds = array<i64: 1, 32>}, {pipeline_mode = #tpu.pipeline_mode<synchronous>, transform_indices = @transform_7, window_bounds = array<i64: 1, 32>}, {pipeline_mode = #tpu.pipeline_mode<synchronous>, transform_indices = @transform_8, window_bounds = array<i64: 1, 32>}, {transform_indices = @transform_9, window_bounds = array<i64: 2, 5, 32>}]} {
    %c0 = arith.constant 0 : index
    %c0_0 = arith.constant 0 : index
    %c0_1 = arith.constant 0 : index
    %0 = vector.load %arg1[%c0, %c0_0, %c0_1] : memref<2x4x8xf32, #tpu.memory_space<vmem>>, vector<2x4x8xf32>
    %1 = vector.shape_cast %0 : vector<2x4x8xf32> to vector<8x8xf32>
    %cst = arith.constant 5.000000e-01 : f32
    %2 = vector.broadcast %cst : f32 to vector<8x8xf32>
    %3 = arith.subf %1, %2 : vector<8x8xf32>
    %cst_2 = arith.constant 2.000000e+00 : f32
    %4 = vector.broadcast %cst_2 : f32 to vector<8x8xf32>
    %5 = arith.divf %3, %4 : vector<8x8xf32>
    %c0_3 = arith.constant 0 : index
    %c0_4 = arith.constant 0 : index
    %6 = vector.load %arg4[%c0_3, %c0_4] : memref<1x8xf32, #tpu.memory_space<vmem>>, vector<1x8xf32>
    %c0_5 = arith.constant 0 : index
    %c0_6 = arith.constant 0 : index
    %7 = vector.load %arg5[%c0_5, %c0_6] : memref<1x8xf32, #tpu.memory_space<vmem>>, vector<1x8xf32>
    %cst_7 = arith.constant dense<0.000000e+00> : vector<8xf32>
    %8 = vector.multi_reduction <add>, %5, %cst_7 [1] : vector<8x8xf32> to vector<8xf32>
    %9 = vector.shape_cast %8 : vector<8xf32> to vector<8x1xf32>
    %cst_8 = arith.constant 8.000000e+00 : f32
    %10 = vector.broadcast %cst_8 : f32 to vector<8x1xf32>
    %11 = arith.divf %9, %10 : vector<8x1xf32>
    %12 = vector.broadcast %11 : vector<8x1xf32> to vector<8x8xf32>
    %13 = arith.subf %5, %12 : vector<8x8xf32>
    %14 = arith.mulf %13, %13 : vector<8x8xf32>
    %cst_9 = arith.constant dense<0.000000e+00> : vector<8xf32>
    %15 = vector.multi_reduction <add>, %14, %cst_9 [1] : vector<8x8xf32> to vector<8xf32>
    %16 = vector.shape_cast %15 : vector<8xf32> to vector<8x1xf32>
    %cst_10 = arith.constant 8.000000e+00 : f32
    %17 = vector.broadcast %cst_10 : f32 to vector<8x1xf32>
    %18 = arith.divf %16, %17 : vector<8x1xf32>
    %19 = vector.broadcast %11 : vector<8x1xf32> to vector<8x8xf32>
    %20 = arith.subf %5, %19 : vector<8x8xf32>
    %cst_11 = arith.constant 9.99999974E-6 : f32
    %21 = vector.broadcast %cst_11 : f32 to vector<8x1xf32>
    %22 = arith.addf %18, %21 : vector<8x1xf32>
    %23 = math.rsqrt %22 : vector<8x1xf32>
    %24 = vector.broadcast %23 : vector<8x1xf32> to vector<8x8xf32>
    %25 = arith.mulf %20, %24 : vector<8x8xf32>
    %26 = vector.broadcast %6 : vector<1x8xf32> to vector<8x8xf32>
    %27 = arith.mulf %25, %26 : vector<8x8xf32>
    %28 = vector.broadcast %7 : vector<1x8xf32> to vector<8x8xf32>
    %29 = arith.addf %27, %28 : vector<8x8xf32>
    %30 = arith.truncf %29 : vector<8x8xf32> to vector<8x8xbf16>
    %c0_12 = arith.constant 0 : index
    %c0_13 = arith.constant 0 : index
    %31 = vector.load %arg6[%c0_12, %c0_13] : memref<8x32xbf16, #tpu.memory_space<vmem>>, vector<8x32xbf16>
    %cst_14 = arith.constant dense<0.000000e+00> : vector<8x32xf32>
    %32 = tpu.matmul %30, %31, %cst_14 {dimension_numbers = #tpu.dot_dimension_numbers<[1], [0], [0], [1], [0, 0, 1, 1], [], []>} : vector<8x8xbf16>, vector<8x32xbf16>, vector<8x32xf32> -> vector<8x32xf32>
    %c0_15 = arith.constant 0 : index
    %c0_16 = arith.constant 0 : index
    %33 = vector.load %arg7[%c0_15, %c0_16] : memref<1x32xf32, #tpu.memory_space<vmem>>, vector<1x32xf32>
    %34 = vector.broadcast %33 : vector<1x32xf32> to vector<8x32xf32>
    %35 = arith.addf %32, %34 : vector<8x32xf32>
    %c0_17 = arith.constant 0 : index
    %c0_18 = arith.constant 0 : index
    %36 = vector.load %arg8[%c0_17, %c0_18] : memref<1x32xf32, #tpu.memory_space<vmem>>, vector<1x32xf32>
    %c0_19 = arith.constant 0 : index
    %c0_20 = arith.constant 0 : index
    %37 = vector.load %arg9[%c0_19, %c0_20] : memref<1x32xf32, #tpu.memory_space<vmem>>, vector<1x32xf32>
    %cst_21 = arith.constant dense<0.000000e+00> : vector<8xf32>
    %38 = vector.multi_reduction <add>, %35, %cst_21 [1] : vector<8x32xf32> to vector<8xf32>
    %39 = vector.shape_cast %38 : vector<8xf32> to vector<8x1xf32>
    %cst_22 = arith.constant 3.200000e+01 : f32
    %40 = vector.broadcast %cst_22 : f32 to vector<8x1xf32>
    %41 = arith.divf %39, %40 : vector<8x1xf32>
    %42 = vector.broadcast %41 : vector<8x1xf32> to vector<8x32xf32>
    %43 = arith.subf %35, %42 : vector<8x32xf32>
    %44 = arith.mulf %43, %43 : vector<8x32xf32>
    %cst_23 = arith.constant dense<0.000000e+00> : vector<8xf32>
    %45 = vector.multi_reduction <add>, %44, %cst_23 [1] : vector<8x32xf32> to vector<8xf32>
    %46 = vector.shape_cast %45 : vector<8xf32> to vector<8x1xf32>
    %cst_24 = arith.constant 3.200000e+01 : f32
    %47 = vector.broadcast %cst_24 : f32 to vector<8x1xf32>
    %48 = arith.divf %46, %47 : vector<8x1xf32>
    %49 = vector.broadcast %41 : vector<8x1xf32> to vector<8x32xf32>
    %50 = arith.subf %35, %49 : vector<8x32xf32>
    %cst_25 = arith.constant 9.99999974E-6 : f32
    %51 = vector.broadcast %cst_25 : f32 to vector<8x1xf32>
    %52 = arith.addf %48, %51 : vector<8x1xf32>
    %53 = math.rsqrt %52 : vector<8x1xf32>
    %54 = vector.broadcast %53 : vector<8x1xf32> to vector<8x32xf32>
    %55 = arith.mulf %50, %54 : vector<8x32xf32>
    %56 = vector.broadcast %36 : vector<1x32xf32> to vector<8x32xf32>
    %57 = arith.mulf %55, %56 : vector<8x32xf32>
    %58 = vector.broadcast %37 : vector<1x32xf32> to vector<8x32xf32>
    %59 = arith.addf %57, %58 : vector<8x32xf32>
    %c0_26 = arith.constant 0 : index
    %c0_27 = arith.constant 0 : index
    %60 = vector.load %arg2[%c0_26, %c0_27] : memref<1x32xf32, #tpu.memory_space<vmem>>, vector<1x32xf32>
    %c0_28 = arith.constant 0 : index
    %c0_29 = arith.constant 0 : index
    %61 = vector.load %arg3[%c0_28, %c0_29] : memref<5x32xf32, #tpu.memory_space<vmem>>, vector<1x32xf32>
    %62 = arith.addf %60, %61 : vector<1x32xf32>
    %63 = vector.shape_cast %62 : vector<1x32xf32> to vector<1x1x32xf32>
    %64 = vector.shape_cast %63 : vector<1x1x32xf32> to vector<1x1x32xf32>
    %65 = vector.broadcast %64 : vector<1x1x32xf32> to vector<2x1x32xf32>
    %c0_30 = arith.constant 0 : index
    %c0_31 = arith.constant 0 : index
    %c0_32 = arith.constant 0 : index
    %66 = vector.load %arg10[%c0_30, %c0_31, %c0_32] : memref<2x5x32xf32, #tpu.memory_space<vmem>>, vector<2x1x32xf32>
    tpu.vector_store %arg10[%c0_30, %c0_31, %c0_32], %65 {strides = array<i32>} : memref<2x5x32xf32, #tpu.memory_space<vmem>>, vector<2x1x32xf32>,
    %67 = vector.shape_cast %59 : vector<8x32xf32> to vector<2x4x32xf32>
    %c1 = arith.constant 1 : index
    %c0_33 = arith.constant 0 : index
    %68 = vector.load %arg3[%c1, %c0_33] : memref<5x32xf32, #tpu.memory_space<vmem>>, vector<4x32xf32>
    %69 = vector.shape_cast %68 : vector<4x32xf32> to vector<1x4x32xf32>
    %70 = vector.broadcast %69 : vector<1x4x32xf32> to vector<2x4x32xf32>
    %71 = arith.addf %67, %70 : vector<2x4x32xf32>
    %c0_34 = arith.constant 0 : index
    %c1_35 = arith.constant 1 : index
    %c0_36 = arith.constant 0 : index
    %72 = vector.load %arg10[%c0_34, %c1_35, %c0_36] : memref<2x5x32xf32, #tpu.memory_space<vmem>>, vector<2x4x32xf32>
    tpu.vector_store %arg10[%c0_34, %c1_35, %c0_36], %71 {strides = array<i32>} : memref<2x5x32xf32, #tpu.memory_space<vmem>>, vector<2x4x32xf32>,
    return
  }
  func.func @transform_0(%arg0: i32) -> (i32, i32, i32) {
    %c0_i32 = arith.constant 0 : i32
    %c0_i32_0 = arith.constant 0 : i32
    %c0_i32_1 = arith.constant 0 : i32
    return %arg0, %c0_i32, %c0_i32_0 : i32, i32, i32
  }
  func.func @transform_1(%arg0: i32) -> (i32, i32) {
    %c0_i32 = arith.constant 0 : i32
    %c0_i32_0 = arith.constant 0 : i32
    %c0_i32_1 = arith.constant 0 : i32
    return %c0_i32, %c0_i32_0 : i32, i32
  }
  func.func @transform_2(%arg0: i32) -> (i32, i32) {
    %c0_i32 = arith.constant 0 : i32
    %c0_i32_0 = arith.constant 0 : i32
    %c0_i32_1 = arith.constant 0 : i32
    return %c0_i32, %c0_i32_0 : i32, i32
  }
  func.func @transform_3(%arg0: i32) -> (i32, i32) {
    %c0_i32 = arith.constant 0 : i32
    %c0_i32_0 = arith.constant 0 : i32
    %c0_i32_1 = arith.constant 0 : i32
    return %c0_i32, %c0_i32_0 : i32, i32
  }
  func.func @transform_4(%arg0: i32) -> (i32, i32) {
    %c0_i32 = arith.constant 0 : i32
    %c0_i32_0 = arith.constant 0 : i32
    %c0_i32_1 = arith.constant 0 : i32
    return %c0_i32, %c0_i32_0 : i32, i32
  }
  func.func @transform_5(%arg0: i32) -> (i32, i32) {
    %c0_i32 = arith.constant 0 : i32
    %c0_i32_0 = arith.constant 0 : i32
    %c0_i32_1 = arith.constant 0 : i32
    return %c0_i32, %c0_i32_0 : i32, i32
  }
  func.func @transform_6(%arg0: i32) -> (i32, i32) {
    %c0_i32 = arith.constant 0 : i32
    %c0_i32_0 = arith.constant 0 : i32
    %c0_i32_1 = arith.constant 0 : i32
    return %c0_i32, %c0_i32_0 : i32, i32
  }
  func.func @transform_7(%arg0: i32) -> (i32, i32) {
    %c0_i32 = arith.constant 0 : i32
    %c0_i32_0 = arith.constant 0 : i32
    %c0_i32_1 = arith.constant 0 : i32
    return %c0_i32, %c0_i32_0 : i32, i32
  }
  func.func @transform_8(%arg0: i32) -> (i32, i32) {
    %c0_i32 = arith.constant 0 : i32
    %c0_i32_0 = arith.constant 0 : i32
    %c0_i32_1 = arith.constant 0 : i32
    return %c0_i32, %c0_i32_0 : i32, i32
  }
  func.func @transform_9(%arg0: i32) -> (i32, i32, i32) {
    %c0_i32 = arith.constant 0 : i32
    %c0_i32_0 = arith.constant 0 : i32
    %c0_i32_1 = arith.constant 0 : i32
    return %arg0, %c0_i32, %c0_i32_0 : i32, i32, i32
  }
}

</mosaic_0001>

<bundles_post_ra>
// kernel: tpu_custom_call.1
= control target key start
LH: loop header
LB: loop body
LE: loop exit
PB: predicated region body
PF: predicated region fallthrough
CT: control target
= control target key end

     0   :  { %14 = vsyncpa [#allocation3], 0  ;;  %s1066_s0 = inlined_call_operand.hbm [shape: f32[4,4,8], index: 0, kind: input, shape index: {}]   ;;  %s1067_s1 = inlined_call_operand.vmem [shape: f32[1,32], index: 1, kind: input, shape index: {}]   ;;  %s1068_s2 = inlined_call_operand.hbm [shape: f32[5,32], index: 2, kind: input, shape index: {}]   ;;  %s1069_s3 = inlined_call_operand.vmem [shape: f32[1,8], index: 3, kind: input, shape index: {}]   ;;  %s1070_s4 = inlined_call_operand.vmem [shape: f32[1,8], index: 4, kind: input, shape index: {}]   ;;  %s1071_s5 = inlined_call_operand.vmem [shape: bf16[8,32], index: 5, kind: input, shape index: {}]   ;;  %s1072_s6 = inlined_call_operand.vmem [shape: f32[1,32], index: 6, kind: input, shape index: {}]   ;;  %s1073_s7 = inlined_call_operand.vmem [shape: f32[1,32], index: 7, kind: input, shape index: {}]   ;;  %s1074_s8 = inlined_call_operand.vmem [shape: f32[1,32], index: 8, kind: input, shape index: {}]   ;;  %s1075_s9 = inlined_call_operand.vmem [shape: f32[4,5,32], index: 9, kind: output, shape index: {}]  }
   0x1   :  { %16 = vsyncpa [#allocation3 + $0x1], 0 }
   0x2   :  { %17 = vsyncpa [#allocation5], 0  ;;  %s889_s30 = smov 0   ;;  %s891_s10 = smov 0  }
   0x3   :  { %s893_s11 = smov 0   ;;  %s895_s12 = smov 0  }
   0x4 LB: > { %s1076_s13 = sadd.s32 4294967295, %s829_s12   ;;  %s909_s14 = sadd.s32 1, %s829_s12   ;;  %s829_s12 = sphi %s895_s12, %s1096_s12   ;;  %s825_s11 = sphi %s893_s11, %s1095_s11   ;;  %s821_s10 = sphi %s891_s10, %s1094_s10   ;;  %s817_s30 = sphi %s889_s30, %s1093_s30  }
   0x5   : > { %s27_s15 = ssub.s32 %s829_s12, %s909_s14  ;;  %s30_s16 = sadd.s32 1, %s825_s11 }
   0x6   : > { %p28_p0 = scmp.eq.s32.totalorder %s27_s15, 0  ;;  %p37_p1 = scmp.ne.s32.totalorder %s825_s11, %s821_s10 }
   0x7   : > { %p38_p2 = scmp.eq.s32.totalorder %s829_s12, 0  ;;  %p43_p3 = scmp.ne.s32.totalorder %s821_s10, %s817_s30 }
   0x8   : > { %s919_s17 = scalar_select %p28_p0, %s825_s11, %s30_s16  }
   0x9   : > { %p921_p4 = por %p38_p2, %p37_p1  ;;  %p927_p5 = scmp.eq.s32.totalorder %s1076_s13, 0 }
   0xa   : > { %p643_p6 = scmp.ge.s32.totalorder %s829_s12, 1  ;;  %p248_p7 = scmp.lt.s32.totalorder %s829_s12, 3 }
   0xb   : > { %s1083_s19 = scalar_select %p927_p5, 1, 0 }
   0xc   : > { %p935_p8 = por %p927_p5, %p43_p3  ;;  %p939_p9 = pnand %p643_p6, %p248_p7 }
   0xd   : > { %s831_s22 = smov [#allocation4]   ;;  %p688_p11 = scmp.lt.s32.totalorder %s829_s12, 2 }
   0xe   : > { %s1084_s20 = scalar_select %p935_p8, 1, 0 }
   0xf   : > { %s1085_s21 = scalar_select %p939_p9, 1, 0 }
  0x10   : > { %s264_s23 = sshll.u32 %s831_s22, 4  ;;  %p679_p10 = pneg %p939_p9  ;;  %s265_s23 = int_to_ptr.vmem [resolvable:$true] %s264_s23 }
  0x11   : > { %s293_s24 = sand.u32 1, %s825_s11   ;;  %p955_p13 = pnand %p688_p11, %p921_p4 }
  0x12   : > { %p949_p12 = pnand %p679_p10, %p927_p5  ;;  %s646_s27 = sshll.u32 %s293_s24, 3 }
  0x13   : > { %s1087_s26 = scalar_select %p955_p13, 1, 0 }
  0x14   : > { %s733_s30 = scalar_lea.hbm %s1068_s2, 128  ;;  %p735_p1 = pneg %p949_p12 }
  0x15   : > { %p734_p0 = scmp.ne.s32.totalorder %s1068_s2, %s733_s30  ;;  %p740_p4 = scmp.lt.u32.totalorder %s733_s30, %s1068_s2 }
  0x17   : > { %p736_p2 = pnand %p735_p1, %p734_p0 }
  0x19   : > { %p737_p3 = pneg %p736_p2 }
  0x1b   : > { %p742_p6 = pnand %p740_p4, %p737_p3 }
  0x1d   : > { %745 = shalt.err (!%p742_p6)
}
  0x1e   : > { %s746_s13 = scalar_lea.vmem %s265_s23, 128  ;;  %p754_p5 = scmp.lt.s32.totalorder %s265_s23, %s265_s23 }
  0x1f   : > { %p747_p7 = scmp.ne.s32.totalorder %s265_s23, %s746_s13  ;;  %p755_p8 = scmp.lt.s32.totalorder %s746_s13, %s746_s13 }
  0x21   : > { %p749_p10 = pnand %p747_p7, %p735_p1  ;;  %p756_p9 = por %p755_p8, %p754_p5 }
  0x23   : > { %p750_p11 = pneg %p749_p10 }
  0x25   : > { %p757_p13 = pnand %p756_p9, %p750_p11 }
  0x27   : > { %760 = shalt.err (!%p757_p13)
}
  0x28   : > { %682 = dma.hbm_to_vmem [thread:$0]  (!%p949_p12), %s1068_s2, 128, %s265_s23, [#allocation5]  }
  0x29   : > { %s664_s30 = sshll.u32 %s829_s12, 7  ;;  %s297_s13 = scalar_lea.vmem [#allocation2], %s646_s27 }
  0x2a   : > { %s979_s22 = scalar_lea.hbm %s1066_s0, %s664_s30  ;;  %s304_s18 = sshll.u32 %s297_s13, 4  ;;  %s981_s18 = int_to_ptr.vmem [resolvable:$true] %s304_s18 }
  0x2b   : > { %s983_s25 = scalar_lea.sflag [#allocation3], %s293_s24  ;;  %s761_s28 = scalar_lea.hbm %s979_s22, 128 }
  0x2c   : > { %p762_p5 = scmp.ne.s32.totalorder %s979_s22, %s761_s28  ;;  %p1088_p8 = scmp.ne.s32.totalorder %s1087_s26, 0 }
  0x2d   : > { %s766_s30 = scalar_lea.hbm %s1066_s0, 256  ;;  %p767_p0 = scmp.lt.u32.totalorder %s979_s22, %s1066_s0 }
  0x2e   : > { %p763_p9 = pneg %p1088_p8  ;;  %p768_p1 = scmp.lt.u32.totalorder %s766_s30, %s761_s28 }
  0x2f   : > { %p770_p3 = scmp.lt.u32.totalorder %s761_s28, %s979_s22 }
  0x30   : > { %p764_p12 = pnand %p763_p9, %p762_p5  ;;  %p769_p2 = por %p768_p1, %p767_p0 }
  0x32   : > { %p765_p13 = pneg %p764_p12  ;;  %p771_p4 = por %p770_p3, %p769_p2 }
  0x34   : > { %p772_p6 = pnand %p771_p4, %p765_p13 }
  0x36   : > { %775 = shalt.err (!%p772_p6)
}
  0x37   : > { %s776_s24 = scalar_lea.vmem %s981_s18, 128  ;;  %s832_s27 = smov [#allocation2]  }
  0x38   : > { %p777_p7 = scmp.ne.s32.totalorder %s981_s18, %s776_s24  ;;  %s781_s13 = sshll.u32 %s832_s27, 4  ;;  %s782_s13 = int_to_ptr.vmem [resolvable:$false] %s781_s13 }
  0x39   : > { %s783_s23 = scalar_lea.vmem %s782_s13, 256  ;;  %p784_p5 = scmp.lt.s32.totalorder %s981_s18, %s782_s13 }
  0x3a   : > { %p779_p10 = pnand %p777_p7, %p763_p9  ;;  %p785_p12 = scmp.lt.s32.totalorder %s783_s23, %s776_s24 }
  0x3c   : > { %p780_p11 = pneg %p779_p10  ;;  %p786_p0 = por %p785_p12, %p784_p5 }
  0x3e   : > { %p787_p1 = pnand %p786_p0, %p780_p11 }
  0x40   : > { %790 = shalt.err (!%p787_p1)
}
  0x41   : > { %s833_s28 = smov 64   ;;  %s834_s29 = smov 4  }
  0x42   : > { %686 = dma.hbm_to_vmem [thread:$0]  (!%p1088_p8), %s979_s22, 128, %s981_s18, %s983_s25, %s833_s28, %s833_s28, %s834_s29  }
  0x43   : > { %p1089_p9 = scmp.ne.s32.totalorder %s1085_s21, 0 }
  0x44   : > { %s318_s30 = sand.u32 (!%p1089_p9), 1, %s821_s10   ;;  %p1090_p13 = scmp.ne.s32.totalorder (!%p1089_p9), %s1084_s20, 0 }
  0x45   : > { %316 = sbr.rel (%p1089_p9) target bundleno = 942 (0x3ae), region = 56  ;;  %s650_s15 = sshll.u32 (!%p1089_p9), %s318_s30, 3 }
  0x46   : > { %s319_s16 = scalar_lea.sflag (!%p1089_p9), [#allocation3], %s318_s30  ;;  %s322_s24 = scalar_lea.vmem (!%p1089_p9), [#allocation2], %s650_s15 }
  0x4c   : > { %808 = dma.done.wait (%p1090_p13), %s319_s16, 128  }
  0x4d   : > { %810 = vsyncadd (%p1090_p13), %s319_s16, 4294967168  ;;  %p1091_p2 = scmp.ne.s32.totalorder %s1083_s19, 0 }
  0x4f   : > { %812 = dma.done.wait (%p1091_p2), [#allocation5], 128  }
  0x50   : > { %814 = vsyncadd (%p1091_p2), [#allocation5], 4294967168  ;;  %v369_v0 = vld [vmem:[%s322_s24] sm:$0xf]  ;;  %v370_v1 = vld [vmem:[%s322_s24 + $0x4] sm:$0xf]  ;;  %v392_v10 = vlaneseq }
  0x51   : > { %v654_v2 = vadd.f32 -0.5, %v369_v0  ;;  %v655_v3 = vadd.f32 -0.5, %v370_v1  ;;  %vm382_vm0 = vcmask 64512   ;;  %v835_v8 = vmov 839922192   ;;  %s1092_s13 = sadd.s32 4294967295, %s829_s12  }
  0x52   : > { %v390_v9 = vunpack.c.l.s4 %v835_v8  ;;  %v836_v11 = vmov 1985246804   ;;  %v393_v14 = vshrl.u32 %v392_v10, 7  ;;  %v463_v28 = vld [vmem:[%s1071_s5] sm:$0xf]  ;;  %vm474_vm1 = vcmask 1043456  }
  0x53   : > { %v374_v4 = vmul.f32 0.5, %v654_v2  ;;  %v375_v5 = vmul.f32 0.5, %v655_v3  ;;  %v397_v12 = vunpack.c.l.s4 %v836_v11  ;;  %v837_v29 = vmov 0.0   ;;  %v656_v34 = vld [vmem:[%s1069_s3] ss:$0 sm:$0xff]  ;;  %s652_s23 = sshll.u32 %s1092_s13, 1 }
  0x54   : > { %v391_v13 = vunpack.c.0.s8 %v390_v9  ;;  %667 = vmatprep.subr.bf16.mxu0 %v837_v29  ;;  %v476_v30 = vsel %vm474_vm1, %v463_v28, 0  ;;  %vm838_vm2 = vmmov 0   ;;  %v657_v36 = vld [vmem:[%s1070_s4] ss:$0 sm:$0xff]  ;;  %v444_v39 = vcombine.high %v656_v34, %v656_v34  ;;  %p363_p8 = scmp.lt.s32.totalorder %s652_s23, 3 }
  0x55   : > { %v380_v6 = vcombine.low %v374_v4, %v375_v5  ;;  %v398_v15 = vunpack.c.0.s8 %v397_v12  ;;  %669 = vmatprep.mubr.msk.bf16.mxu0 %vm838_vm2, %v837_v29  ;;  %668 = vmatpush3.bf16.msra.mxu0 %v476_v30  ;;  %v454_v42 = vcombine.high %v657_v36, %v657_v36  ;;  %v658_v49 = vld [vmem:[%s1072_s6] ss:$0 sm:$0xff]  ;;  %vm520_vm3 = vcmask 261120   ;;  %v550_v57 = vld [vmem:[#allocation4] sm:$0x1] }
  0x56   : > { %v394_v16 = vsub.s32 %v391_v13, %v393_v14  ;;  %v549_v56 = vld [vmem:[%s1067_s1] sm:$0x1]  ;;  %s1098_s23 = smov (!%p363_p8, %s652_s23), 3  ;;  %vm552_vm4 = vcmask 253952   ;;  %v558_v8 = vld [vmem:[#allocation4 + $0x1] sm:$0xf] }
  0x57   : > { %v383_v7 = vsel %vm382_vm0, %v380_v6, 0.0  ;;  %v401_v17 = vsub.s32 %v398_v15, %v393_v14  ;;  %v551_v58 = vadd.f32 %v550_v57, %v549_v56  ;;  %s653_s30 = sshll.u32 %s1098_s23, 3  ;;  %v661_v6 = vld [vmem:[%s1074_s8] ss:$0 sm:$0xff]  ;;  %vm561_vm5 = vcmask 257024  }
  0x58   : > { %384 = vadd.xlane.f32.xlu0 %v383_v7  ;;  %s366_s24 = scalar_lea.vmem %s1075_s9, %s653_s30 }
  0x59   : > { %553 = vst.msk [vmem:[%s366_s24] sm:$0x1] %vm552_vm4, %v551_v58  ;;  %554 = vst.msk [vmem:[%s366_s24 + $0x8] sm:$0x1] %vm552_vm4, %v551_v58 }
  0xe5   : > { %v385_v18 = vpop.xlane.xlu0 %384 }
  0xe6   : > { %v387_v19 = vmul.f32 0.125, %v385_v18 }
  0xe8   : > { %v395_v20 = vrot.slane %v387_v19, %v394_v16  ;;  %v402_v21 = vrot.slane %v387_v19, %v401_v17 }
  0xea   : > { %v405_v22 = vsub.f32 %v374_v4, %v395_v20  ;;  %v406_v23 = vsub.f32 %v375_v5, %v402_v21  ;;  %v660_v4 = vld [vmem:[%s1073_s7] ss:$0 sm:$0xff] }
  0xec   : > { %v407_v24 = vmul.f32 %v405_v22, %v405_v22  ;;  %v408_v25 = vmul.f32 %v406_v23, %v406_v23 }
  0xee   : > { %v411_v26 = vcombine.low %v407_v24, %v408_v25 }
  0xf0   : > { %v413_v27 = vsel %vm382_vm0, %v411_v26, 0.0 }
  0xf1   : > { %414 = vadd.xlane.f32.xlu0 %v413_v27 }
 0x17e   : > { %v415_v31 = vpop.xlane.xlu0 %414 }
 0x17f   : > { %v416_v32 = vmul.f32 0.125, %v415_v31 }
 0x181   : > { %v417_v33 = vadd.f32 1e-05, %v416_v32 }
 0x183   : > { %729 = vrsqrt.f32 %v417_v33 }
 0x18d   : > { %v730_v35 = vpop.eup %729 }
 0x18e   : > { %v426_v37 = vrot.slane %v730_v35, %v394_v16  ;;  %v433_v38 = vrot.slane %v730_v35, %v401_v17 }
 0x190   : > { %v436_v40 = vmul.f32 %v426_v37, %v405_v22  ;;  %v437_v41 = vmul.f32 %v433_v38, %v406_v23 }
 0x192   : > { %v446_v43 = vmul.f32 %v656_v34, %v436_v40  ;;  %v447_v44 = vmul.f32 %v444_v39, %v437_v41 }
 0x194   : > { %v456_v45 = vadd.f32 %v657_v36, %v446_v43  ;;  %v457_v46 = vadd.f32 %v454_v42, %v447_v44 }
 0x196   : > { %v460_v47 = vcombine.low %v456_v45, %v457_v46 }
 0x198   : > { %v462_v48 = vpack.c.bf16 %v460_v47, %v460_v47 }
 0x19a   : > { %670 = vmatmul.mubr.msk.bf16.vlgmr.msra.gmra.mrb[0].mxu0 %vm382_vm0, %v462_v48 }
 0x26d   : > { %v512_v50 = vpop.f32.mrb[0].mxu0 }
 0x26e   : > { %v513_v51 = vadd.f32 %v658_v49, %v512_v50  ;;  %v671_v52 = vpop.f32.mrb[1].mxu0 }
 0x26f   : > { %v515_v53 = vpop.f32.mrb[2].mxu0 }
 0x270   : > { %v672_v54 = vpop.f32.mrb[3].mxu0  ;;  %v521_v55 = vsel %vm520_vm3, %v513_v51, 0.0 }
 0x271   : > { %522 = vadd.xlane.f32.xlu1 %v521_v55 }
 0x2fe   : > { %v523_v59 = vpop.xlane.xlu1 %522 }
 0x2ff   : > { %v525_v60 = vmul.f32 0.03125, %v523_v59 }
 0x301   : > { %v526_v61 = vsub.f32 %v513_v51, %v525_v60 }
 0x303   : > { %v527_v62 = vmul.f32 %v526_v61, %v526_v61 }
 0x305   : > { %v528_v63 = vsel %vm520_vm3, %v527_v62, 0.0 }
 0x306   : > { %529 = vadd.xlane.f32.xlu1 %v528_v63 }
 0x393   : > { %v530_v0 = vpop.xlane.xlu1 %529 }
 0x394   : > { %v531_v1 = vmul.f32 0.03125, %v530_v0 }
 0x396   : > { %v532_v2 = vadd.f32 1e-05, %v531_v1 }
 0x398   : > { %731 = vrsqrt.f32 %v532_v2 }
 0x3a2   : > { %v732_v3 = vpop.eup %731 }
 0x3a3   : > { %v534_v5 = vmul.f32 %v732_v3, %v526_v61 }
 0x3a5   : > { %v541_v7 = vmul.f32 %v660_v4, %v534_v5 }
 0x3a7   : > { %v548_v9 = vadd.f32 %v661_v6, %v541_v7 }
 0x3a9   : > { %v556_v10 = vcombine.high %v548_v9, %v548_v9  ;;  %v559_v11 = vadd.f32 %v558_v8, %v548_v9 }
 0x3ab   : > { %v560_v12 = vadd.f32 %v558_v8, %v556_v10  ;;  %562 = vst.msk [vmem:[%s366_s24 + $0x1] sm:$0xf] %vm561_vm5, %v559_v11 }
 0x3ad   : > { %563 = vst.msk [vmem:[%s366_s24 + $0x9] sm:$0xf] %vm561_vm5, %v560_v12 }
 0x3ae PF: > { %p20_p3 = scmp.ge.s32.totalorder %s909_s14, 4   ;;  %s1093_s30 = smov %s821_s10 }
 0x3af   : > { %s1094_s10 = smov %s825_s11  ;;  %s1095_s11 = smov %s919_s17 }
 0x3b0   : > { %s1096_s12 = smov %s909_s14  ;;  %22 = sbr.rel (!%p20_p3) target bundleno = 4 (0x4), region = 100 }
 0x3b7   :  { %586 = vsyncpa [#allocation3], 1 }
 0x3b8   :  { %588 = vsyncpa [#allocation3 + $0x1], 1 }
 0x3b9   :  { %589 = vsyncpa [#allocation5], 1 }

</bundles_post_ra>
